<compile_context>
chip_gen: v7x
topology: tpu7x:2x2x1
jax: 0.10.0
libtpu: 0.0.40
codegen_flags: <defaults>
</compile_context>

<pallas_src>
import functools

import jax
import jax.numpy as jnp
from jax.experimental import pallas as pl
from jax.experimental.pallas import tpu as pltpu


def _round_up(x: int, m: int) -> int:
    return ((x + m - 1) // m) * m


# ----------------------------------------------------------------------------
# TPU path: in-kernel hardware PRNG, no tensor inputs, tiled batch axis.
# ----------------------------------------------------------------------------
def _prng_dist_kernel(seed_ref, o_ref, *, t_true: int, t_pad: int):
    # Distinct stream per grid step / TensorCore.
    pltpu.prng_seed(seed_ref[0], pl.program_id(0))

    shape = o_ref.shape  # (TB, t_pad)
    bits = pltpu.bitcast(pltpu.prng_random_bits(shape), jnp.uint32)
    # Mantissa-stuffing: build a float32 in [1, 2) then subtract 1 -> [0, 1).
    mant = (bits & jnp.uint32(0x007FFFFF)) | jnp.uint32(0x3F800000)
    raw = pltpu.bitcast(mant, jnp.float32) - 1.0

    if t_pad != t_true:
        col = jax.lax.broadcasted_iota(jnp.int32, shape, dimension=1)
        raw = jnp.where(col < t_true, raw, 0.0)

    denom = jnp.maximum(jnp.sum(raw, axis=-1, keepdims=True), 1e-30)
    inv = pl.reciprocal(denom, approx=True)      # EUP slot, off the VALU path
    inv = inv * (2.0 - denom * inv)              # one Newton refinement step
    o_ref[...] = (raw * inv).astype(o_ref.dtype)


def _buy_random_distribution_tpu(B: int, T: int, dtype, seed: int) -> jax.Array:
    t_pad = _round_up(T, 128)                    # lane-dense output
    itemsize = 4                                 # randoms computed in f32
    # Largest row tile (multiple of 16 sublanes) with <= ~4 MiB per block.
    max_rows = max(16, ((4 << 20) // (t_pad * itemsize)) // 16 * 16)
    tb = min(_round_up(B, 16), max_rows)
    b_pad = _round_up(B, tb)
    n_tiles = b_pad // tb

    kernel = functools.partial(_prng_dist_kernel, t_true=T, t_pad=t_pad)
    seed_arr = jnp.asarray([seed], dtype=jnp.int32)

    out = pl.pallas_call(
        kernel,
        out_shape=jax.ShapeDtypeStruct((b_pad, t_pad), dtype),
        grid_spec=pltpu.PrefetchScalarGridSpec(
            num_scalar_prefetch=1,               # seed lands in SMEM
            grid=(n_tiles,),
            in_specs=[],                         # no tensor inputs -> no input DMA
            out_specs=pl.BlockSpec((tb, t_pad), lambda i, seed: (i, 0)),
        ),
        compiler_params=pltpu.CompilerParams(
            dimension_semantics=("parallel",),   # shard row tiles across cores
            has_side_effects=True,               # PRNG state mutation
            vmem_limit_bytes=32 << 20,
        ),
        cost_estimate=pl.CostEstimate(
            flops=6 * b_pad * t_pad,
            transcendentals=0,
            bytes_accessed=b_pad * t_pad * jnp.dtype(dtype).itemsize,
        ),
    )(seed_arr)
    return out[:B, :T]


# ----------------------------------------------------------------------------
# Portable fallback (non-TPU backends / interpret mode): randoms are drawn
# outside the kernel; the Pallas kernel performs the row normalization.
# ----------------------------------------------------------------------------
def _normalize_kernel(x_ref, o_ref):
    raw = x_ref[...].astype(jnp.float32)
    denom = jnp.maximum(jnp.sum(raw, axis=-1, keepdims=True), 1e-30)
    o_ref[...] = (raw / denom).astype(o_ref.dtype)


def _buy_random_distribution_portable(B: int, T: int, dtype, seed: int) -> jax.Array:
    key = jax.random.PRNGKey(seed)
    raw = jax.random.uniform(key, (B, T), dtype=jnp.float32)
    return pl.pallas_call(
        _normalize_kernel,
        out_shape=jax.ShapeDtypeStruct((B, T), dtype),
    )(raw)


# ----------------------------------------------------------------------------
# Public wrapper: same semantics as BuyRandomDistributionModule.forward.
# ----------------------------------------------------------------------------
def buy_random_distribution(num_shares_owned: jax.Array, seed: int = 0) -> jax.Array:
    """Random distribution (rows sum to 1 along the last dim), same shape/dtype."""
    orig_shape = num_shares_owned.shape
    dtype = num_shares_owned.dtype
    T = orig_shape[-1]
    B = 1
    for d in orig_shape[:-1]:
        B *= int(d)
    B = max(B, 1)

    if jax.default_backend() == "tpu":
        out2d = _buy_random_distribution_tpu(B, T, dtype, seed)
    else:
        # TODO(synk): pltpu.prng_seed has no CPU/interpret lowering; fall back
        # to host-side randoms + Pallas normalization on non-TPU backends.
        out2d = _buy_random_distribution_portable(B, T, dtype, seed)

    return out2d.reshape(orig_shape)


if __name__ == "__main__":
    key = jax.random.PRNGKey(0)
    # batch=8 portfolios, tickers=128 (last dim = lane axis)
    num_shares_owned = jax.random.randint(key, (8, 128), 0, 100).astype(jnp.float32)

    out = buy_random_distribution(num_shares_owned, seed=0)
    out = jax.block_until_ready(out)

    # Sanity checks: shape/dtype preserved, rows sum to 1, values in [0, 1].
    assert out.shape == num_shares_owned.shape
    assert out.dtype == num_shares_owned.dtype
    row_sums = jnp.sum(out, axis=-1)
    assert jnp.allclose(row_sums, 1.0, atol=1e-4), row_sums
    assert bool(jnp.all(out >= 0.0)) and bool(jnp.all(out <= 1.0))

    print("KERNEL_OK")
</pallas_src>

<mosaic_0001>
module attributes {stable_mosaic.version = 11 : i64} {
  func.func @_normalize_kernel(%arg0: memref<8x128xf32, #tpu.memory_space<vmem>>, %arg1: memref<8x128xf32, #tpu.memory_space<vmem>>) attributes {dimension_semantics = [], scalar_prefetch = 0 : i64, scratch_operands = 0 : i64, tpu.core_type = #tpu.core_type<tc>} {
    %c0 = arith.constant 0 : index
    %c0_0 = arith.constant 0 : index
    %0 = vector.load %arg0[%c0, %c0_0] : memref<8x128xf32, #tpu.memory_space<vmem>>, vector<8x128xf32>
    %cst = arith.constant dense<0.000000e+00> : vector<8xf32>
    %1 = vector.multi_reduction <add>, %0, %cst [1] : vector<8x128xf32> to vector<8xf32>
    %2 = vector.shape_cast %1 : vector<8xf32> to vector<8x1xf32>
    %cst_1 = arith.constant 1.000000e-30 : f32
    %3 = vector.broadcast %cst_1 : f32 to vector<8x1xf32>
    %4 = arith.maximumf %2, %3 : vector<8x1xf32>
    %5 = vector.broadcast %4 : vector<8x1xf32> to vector<8x128xf32>
    %6 = arith.divf %0, %5 : vector<8x128xf32>
    %c0_2 = arith.constant 0 : index
    %c0_3 = arith.constant 0 : index
    %7 = vector.load %arg1[%c0_2, %c0_3] : memref<8x128xf32, #tpu.memory_space<vmem>>, vector<8x128xf32>
    tpu.vector_store %arg1[%c0_2, %c0_3], %6 {strides = array<i32>} : memref<8x128xf32, #tpu.memory_space<vmem>>, vector<8x128xf32>,
    return
  }
}

</mosaic_0001>

<bundles_post_ra>
// kernel: tpu_custom_call.1
= control target key start
LH: loop header
LB: loop body
LE: loop exit
PB: predicated region body
PF: predicated region fallthrough
CT: control target
= control target key end

     0   :  { %6 = vsyncpa [#allocation3], 0  ;;  %s131_s0 = inlined_call_operand.hbm [shape: f32[8,128], index: 0, kind: input, shape index: {}]   ;;  %s132_s1 = inlined_call_operand.hbm [shape: f32[8,128], index: 1, kind: output, shape index: {}]  }
   0x1   :  { %7 = vsyncpa [#allocation4], 0  ;;  %s95_s6 = smov [#allocation2]   ;;  %s47_s10 = scalar_lea.hbm %s131_s0, 128 }
   0x2   :  { %s14_s7 = sshll.u32 %s95_s6, 4  ;;  %p48_p0 = scmp.ne.s32.totalorder %s131_s0, %s47_s10  ;;  %s15_s7 = int_to_ptr.vmem [resolvable:$true] %s14_s7 }
   0x3   :  { %p51_p1 = scmp.lt.u32.totalorder %s47_s10, %s131_s0 }
   0x5   :  { %p53_p2 = pnand %p51_p1, %p48_p0 }
   0x7   :  { %56 = shalt.err (!%p53_p2)
}
   0x8   :  { %s57_s15 = scalar_lea.vmem %s15_s7, 128  ;;  %p62_p4 = scmp.lt.s32.totalorder %s15_s7, %s15_s7 }
   0x9   :  { %p58_p3 = scmp.ne.s32.totalorder %s15_s7, %s57_s15  ;;  %p63_p5 = scmp.lt.s32.totalorder %s57_s15, %s57_s15 }
   0xb   :  { %p64_p6 = por %p63_p5, %p62_p4 }
   0xd   :  { %p65_p7 = pnand %p64_p6, %p58_p3 }
   0xf   :  { %68 = shalt.err (!%p65_p7)
}
  0x10   :  { %17 = dma.hbm_to_vmem [thread:$0]  %s131_s0, 128, %s15_s7, [#allocation3]  }
  0x11   :  { %91 = dma.done.wait [#allocation3], 128  }
  0x12   :  { %92 = vsyncadd [#allocation3], 4294967168  ;;  %v21_v0 = vld [vmem:[#allocation2] sm:$0xff]  ;;  %s96_s18 = smov [#allocation5]  }
  0x13   :  { %22 = vadd.xlane.f32.xlu0 %v21_v0  ;;  %s34_s19 = sshll.u32 %s96_s18, 4  ;;  %s35_s19 = int_to_ptr.vmem [resolvable:$true] %s34_s19 }
  0x14   :  { %s69_s20 = scalar_lea.vmem %s35_s19, 128  ;;  %p74_p9 = scmp.lt.s32.totalorder %s35_s19, %s35_s19 }
  0x15   :  { %p70_p8 = scmp.ne.s32.totalorder %s35_s19, %s69_s20  ;;  %p75_p10 = scmp.lt.s32.totalorder %s69_s20, %s69_s20 }
  0x17   :  { %p76_p11 = por %p75_p10, %p74_p9 }
  0x19   :  { %p77_p12 = pnand %p76_p11, %p70_p8 }
  0xa0   :  { %v23_v1 = vpop.xlane.xlu0 %22 }
  0xa1   :  { %v24_v2 = vmax.f32 %v23_v1, 1e-30 }
  0xa3   :  { %45 = vrcp.f32 %v24_v2 }
  0xad   :  { %v46_v3 = vpop.eup %45 }
  0xae   :  { %v26_v4 = vmul.f32 %v46_v3, %v21_v0 }
  0xb0   :  { %27 = vst [vmem:[#allocation5] sm:$0xff] %v26_v4 }
  0xb1   :  { %80 = shalt.err (!%p77_p12)
}
  0xb2   :  { %s81_s22 = scalar_lea.hbm %s132_s1, 128 }
  0xb3   :  { %p82_p13 = scmp.ne.s32.totalorder %s132_s1, %s81_s22  ;;  %p85_p0 = scmp.lt.u32.totalorder %s81_s22, %s132_s1 }
  0xb5   :  { %p87_p1 = pnand %p85_p0, %p82_p13 }
  0xb7   :  { %90 = shalt.err (!%p87_p1)
}
  0xb8   :  { %37 = dma.vmem_to_hbm [thread:$0]  %s35_s19, 128, %s132_s1, [#allocation4]  }
  0xb9   :  { %93 = dma.done.wait [#allocation4], 128  }
  0xba   :  { %94 = vsyncadd [#allocation4], 4294967168 }
  0xbb   :  { %41 = vsyncpa [#allocation3], 1 }
  0xbc   :  { %42 = vsyncpa [#allocation4], 1 }

</bundles_post_ra>
